<compile_context>
chip_gen: v6e
topology: v6e:2x2x1
jax: 0.10.0
libtpu: 0.0.40
codegen_flags: <defaults>
</compile_context>

<pallas_src>
import functools

import jax
import jax.numpy as jnp
from jax.experimental import pallas as pl
from jax.experimental.pallas import tpu as pltpu


# ---------------------------------------------------------------------------
# Kernels
# ---------------------------------------------------------------------------
def _fused_stats(t_f32, n_valid):
    """Single-sweep per-row mean / unbiased std over the last axis (f32 accum).

    NOTE: n_valid == 1 gives a divide-by-zero -> NaN/Inf, which intentionally
    matches torch.std's unbiased default for a single spatial element.
    """
    n = jnp.float32(n_valid)
    s = jnp.sum(t_f32, axis=-1, keepdims=True)
    ssq = jnp.sum(t_f32 * t_f32, axis=-1, keepdims=True)
    mean = s / n
    # Clamp guards tiny negative variances from E[x^2]-E[x]^2 cancellation.
    var = jnp.maximum((ssq - n * mean * mean) / (n - 1.0), 0.0)
    return mean, jnp.sqrt(var)


def _cross_norm_kernel_pair(x_ref, xr_ref, o_ref, *, n_valid, eps, bf16_combine):
    """One block = (ROW_TILE, N); per-row stats over the last axis, two inputs."""
    x_in = x_ref[...]
    r_in = xr_ref[...]
    x = x_in.astype(jnp.float32)
    r = r_in.astype(jnp.float32)

    mean_x, std_x = _fused_stats(x, n_valid)
    mean_r, std_r = _fused_stats(r, n_valid)

    scale = std_r / (std_x + eps)  # exact; (tile,1) column -> negligible cost
    if bf16_combine:
        out = (x_in - mean_x.astype(x_in.dtype)) * scale.astype(x_in.dtype) \
              + mean_r.astype(x_in.dtype)
        o_ref[...] = out.astype(o_ref.dtype)
    else:
        o_ref[...] = ((x - mean_x) * scale + mean_r).astype(o_ref.dtype)


def _cross_norm_kernel_self(x_ref, o_ref, *, n_valid, eps, bf16_combine):
    """Self-normalization (x_ref is x): single input stream, stats computed once."""
    x_in = x_ref[...]
    x = x_in.astype(jnp.float32)

    mean_x, std_x = _fused_stats(x, n_valid)
    scale = std_x / (std_x + eps)
    if bf16_combine:
        out = (x_in - mean_x.astype(x_in.dtype)) * scale.astype(x_in.dtype) \
              + mean_x.astype(x_in.dtype)
        o_ref[...] = out.astype(o_ref.dtype)
    else:
        o_ref[...] = ((x - mean_x) * scale + mean_x).astype(o_ref.dtype)


# ---------------------------------------------------------------------------
# Tile sizing
# ---------------------------------------------------------------------------
_SUBLANE = 8
_MIN_BLOCK_BYTES = 1 << 20  # don't shrink per-stream blocks below this for step count


def _vmem_budget_bytes():
    """VMEM budget derived from the actual chip (70% of physical, with floor)."""
    try:
        cap = int(pltpu.get_tpu_info().vmem_capacity_bytes)
    except Exception:  # pragma: no cover - conservative fallback (v7x-sized)
        cap = 64 << 20
    # ~70% of physical VMEM: ~44 MiB on v7x, ~89 MiB on v5e/v6e.
    return max(32 << 20, int(cap * 0.7))


def _num_tensorcores():
    """Best-effort TensorCore count (2 on v7x, 1 on v5e/v6e); safe fallback 2."""
    try:
        info = pltpu.get_tpu_info()
        for attr in ("num_cores", "core_count", "tensorcore_count", "num_tensorcores"):
            v = getattr(info, attr, None)
            if v:
                return int(v)
    except Exception:
        pass
    try:
        v = getattr(jax.devices()[0], "num_cores", None)
        if v:
            return int(v)
    except Exception:
        pass
    return 2  # covers v7x's 2 TCs; at most costs one extra grid step on 1-TC chips


def _row_bytes(N, in_itemsize, n_in_streams, out_itemsize):
    """VMEM bytes per block row: double-buffered streams + in-body f32 temps."""
    row_pipeline = 2 * (n_in_streams * N * in_itemsize + N * out_itemsize)
    # f32 copies of each input tile + centered/output temporaries.
    row_compute = (2 + 2 * n_in_streams) * N * 4
    return row_pipeline + row_compute


def _pick_row_tile(R, N, in_itemsize, n_in_streams, out_itemsize, vmem_budget, n_cores):
    """Largest sublane-aligned row tile that fits VMEM / the per-chip block target."""
    if R <= _SUBLANE:
        # Block row dim equal to the full array dim is always legal.
        return R

    row_bytes = _row_bytes(N, in_itemsize, n_in_streams, out_itemsize)
    max_rows_vmem = max(_SUBLANE, vmem_budget // row_bytes)

    # Per-stream block target scales with the chip's VMEM budget:
    # ~4 MiB on v7x (44 MiB budget), ~8 MiB on v5e/v6e (89 MiB budget).
    target_block_bytes = min(16 << 20, max(2 << 20, vmem_budget // 12))
    target_rows = max(_SUBLANE, target_block_bytes // (N * 4))

    tile = min(max_rows_vmem, target_rows, R)
    tile = max(_SUBLANE, (tile // _SUBLANE) * _SUBLANE)

    # Core-count-aware step floor: aim for >= 2 steps per TensorCore (so v7x's
    # two cores get balanced, pipelined work), but never shrink a per-stream
    # block below ~1 MiB (DMA-efficiency floor).
    min_block_rows = max(_SUBLANE, _MIN_BLOCK_BYTES // max(N * in_itemsize, 1))
    desired_steps = 2 * max(1, n_cores)
    steps = pl.cdiv(R, tile)
    if steps < desired_steps:
        cand = max(_SUBLANE, (pl.cdiv(R, desired_steps) // _SUBLANE) * _SUBLANE)
        if cand >= min_block_rows:
            tile = min(tile, cand)
            steps = pl.cdiv(R, tile)

    # Prefer an even step count (balanced megacore halves), if it stays cheap.
    if steps > 1 and steps % 2 == 1:
        cand = max(_SUBLANE, (pl.cdiv(R, steps + 1) // _SUBLANE) * _SUBLANE)
        if cand >= min_block_rows and pl.cdiv(R, cand) % 2 == 0:
            tile = cand

    return tile


# ---------------------------------------------------------------------------
# Wrapper
# ---------------------------------------------------------------------------
def cross_normalization(x, x_ref=None, *, eps=1e-05):
    """CrossNormalization forward with dims=(2, 3) on an NCHW tensor."""
    B, C, H, W = x.shape
    R = B * C
    N = H * W
    # NOTE: N == 1 yields NaN/Inf (unbiased std divides by N-1), matching torch.

    self_norm = x_ref is None
    bf16_combine = x.dtype == jnp.bfloat16

    x2 = x.reshape(R, N)
    if self_norm:
        kernel = functools.partial(
            _cross_norm_kernel_self, n_valid=N, eps=eps, bf16_combine=bf16_combine)
        inputs = (x2,)
        n_in = 1
    else:
        kernel = functools.partial(
            _cross_norm_kernel_pair, n_valid=N, eps=eps, bf16_combine=bf16_combine)
        inputs = (x2, x_ref.reshape(R, N))
        n_in = 2

    budget = _vmem_budget_bytes()
    n_cores = _num_tensorcores()
    tile = _pick_row_tile(R, N, x.dtype.itemsize, n_in, x.dtype.itemsize,
                          budget, n_cores)

    # Right-size the VMEM limit to the actual pipeline footprint (+margin)
    # instead of claiming the whole budget, so surrounding fusions keep VMEM.
    footprint = tile * _row_bytes(N, x.dtype.itemsize, n_in, x.dtype.itemsize)
    vmem_limit = min(budget, max(int(footprint * 1.25) + (2 << 20), 16 << 20))

    block = pl.BlockSpec((tile, N), lambda i: (i, 0))

    # No padding: the tail block (when tile does not divide R) reads garbage
    # rows whose per-row results are dropped on store. Rows are independent,
    # so this is safe; any cross-row op would break this invariant.
    out2 = pl.pallas_call(
        kernel,
        out_shape=jax.ShapeDtypeStruct((R, N), x.dtype),
        grid_spec=pltpu.PrefetchScalarGridSpec(
            num_scalar_prefetch=0,
            grid=(pl.cdiv(R, tile),),
            in_specs=[block] * n_in,
            out_specs=block,
        ),
        compiler_params=pltpu.CompilerParams(
            dimension_semantics=("parallel",),
            vmem_limit_bytes=vmem_limit,
        ),
    )(*inputs)

    return out2.reshape(B, C, H, W)


# ---------------------------------------------------------------------------
# Pure-JAX reference (mirrors the PyTorch forward, unbiased std)
# ---------------------------------------------------------------------------
def _cross_normalization_ref(x, x_ref=None, eps=1e-05, dims=(2, 3)):
    if x_ref is None:
        x_ref = x
    n = 1
    for d in dims:
        n *= x.shape[d]

    def _stats(t):
        m = jnp.mean(t, axis=dims, keepdims=True)
        v = jnp.sum((t - m) ** 2, axis=dims, keepdims=True) / (n - 1)
        return m, jnp.sqrt(v)

    mean_r, std_r = _stats(x_ref)
    mean_x, std_x = _stats(x)
    return (x - mean_x) * (std_r / (std_x + eps)) + mean_r


if __name__ == "__main__":
    key = jax.random.PRNGKey(0)
    k1, k2, k3, k4 = jax.random.split(key, 4)

    # Exact reciprocal + f32 single-pass stats: back to tight tolerances.
    ATOL = RTOL = 1e-4

    # --- Case 1: standard cross-normalization -------------------------------
    B, C, H, W = 2, 4, 16, 16
    x = jax.random.normal(k1, (B, C, H, W), dtype=jnp.float32) * 2.0 + 0.5
    xr = jax.random.normal(k2, (B, C, H, W), dtype=jnp.float32) * 0.7 - 1.0

    out = jax.block_until_ready(cross_normalization(x, xr))
    expected = _cross_normalization_ref(x, xr)
    assert out.shape == x.shape and out.dtype == x.dtype
    assert jnp.allclose(out, expected, atol=ATOL, rtol=RTOL), (
        float(jnp.max(jnp.abs(out - expected)))
    )

    # --- Case 2: self-normalization (x_ref=None) -> single-input kernel -----
    out_self = jax.block_until_ready(cross_normalization(x))
    expected_self = _cross_normalization_ref(x)
    assert jnp.allclose(out_self, expected_self, atol=ATOL, rtol=RTOL), (
        float(jnp.max(jnp.abs(out_self - expected_self)))
    )

    # --- Case 3: B*C not a multiple of the row tile (exercises the no-pad
    #     boundary block whose out-of-range rows are dropped on store) -------
    B2, C2, H2, W2 = 3, 5, 16, 8  # R = 15, N = 128
    xb = jax.random.normal(k3, (B2, C2, H2, W2), dtype=jnp.float32) * 1.5 - 0.3
    xbr = jax.random.normal(k4, (B2, C2, H2, W2), dtype=jnp.float32) * 0.9 + 0.2

    out_b = jax.block_until_ready(cross_normalization(xb, xbr))
    expected_b = _cross_normalization_ref(xb, xbr)
    assert jnp.allclose(out_b, expected_b, atol=ATOL, rtol=RTOL), (
        float(jnp.max(jnp.abs(out_b - expected_b)))
    )

    # --- Case 4: bf16 inputs (exercises the bf16 final-combine path) --------
    xh = (jax.random.normal(k1, (B, C, H, W), dtype=jnp.float32) * 1.3 + 0.2
          ).astype(jnp.bfloat16)
    xhr = (jax.random.normal(k2, (B, C, H, W), dtype=jnp.float32) * 0.8 - 0.4
           ).astype(jnp.bfloat16)
    out_h = jax.block_until_ready(cross_normalization(xh, xhr))
    expected_h = _cross_normalization_ref(
        xh.astype(jnp.float32), xhr.astype(jnp.float32)).astype(jnp.bfloat16)
    assert out_h.dtype == jnp.bfloat16
    assert jnp.allclose(out_h.astype(jnp.float32), expected_h.astype(jnp.float32),
                        atol=5e-2, rtol=5e-2), (
        float(jnp.max(jnp.abs(out_h.astype(jnp.float32)
                              - expected_h.astype(jnp.float32))))
    )

    print("KERNEL_OK")
</pallas_src>

<mosaic_0001>
module attributes {stable_mosaic.version = 11 : i64} {
  func.func @_cross_norm_kernel_pair(%arg0: i32, %arg1: memref<8x256xf32, #tpu.memory_space<vmem>>, %arg2: memref<8x256xf32, #tpu.memory_space<vmem>>, %arg3: memref<8x256xf32, #tpu.memory_space<vmem>>) attributes {dimension_semantics = [#tpu.dimension_semantics<parallel>], iteration_bounds = array<i64: 1>, scalar_prefetch = 0 : i64, scratch_operands = 0 : i64, tpu.core_type = #tpu.core_type<tc>, window_params = [{transform_indices = @transform_0, window_bounds = array<i64: 8, 256>}, {transform_indices = @transform_1, window_bounds = array<i64: 8, 256>}, {transform_indices = @transform_2, window_bounds = array<i64: 8, 256>}]} {
    %c0 = arith.constant 0 : index
    %c0_0 = arith.constant 0 : index
    %0 = vector.load %arg1[%c0, %c0_0] : memref<8x256xf32, #tpu.memory_space<vmem>>, vector<8x256xf32>
    %c0_1 = arith.constant 0 : index
    %c0_2 = arith.constant 0 : index
    %1 = vector.load %arg2[%c0_1, %c0_2] : memref<8x256xf32, #tpu.memory_space<vmem>>, vector<8x256xf32>
    %cst = arith.constant dense<0.000000e+00> : vector<8xf32>
    %2 = vector.multi_reduction <add>, %0, %cst [1] : vector<8x256xf32> to vector<8xf32>
    %3 = vector.shape_cast %2 : vector<8xf32> to vector<8x1xf32>
    %4 = arith.mulf %0, %0 : vector<8x256xf32>
    %cst_3 = arith.constant dense<0.000000e+00> : vector<8xf32>
    %5 = vector.multi_reduction <add>, %4, %cst_3 [1] : vector<8x256xf32> to vector<8xf32>
    %6 = vector.shape_cast %5 : vector<8xf32> to vector<8x1xf32>
    %cst_4 = arith.constant 2.560000e+02 : f32
    %7 = vector.broadcast %cst_4 : f32 to vector<8x1xf32>
    %8 = arith.divf %3, %7 : vector<8x1xf32>
    %cst_5 = arith.constant 2.560000e+02 : f32
    %9 = vector.broadcast %cst_5 : f32 to vector<8x1xf32>
    %10 = arith.mulf %9, %8 : vector<8x1xf32>
    %11 = arith.mulf %10, %8 : vector<8x1xf32>
    %12 = arith.subf %6, %11 : vector<8x1xf32>
    %cst_6 = arith.constant 2.560000e+02 : f32
    %cst_7 = arith.constant 1.000000e+00 : f32
    %13 = arith.subf %cst_6, %cst_7 : f32
    %14 = vector.broadcast %13 : f32 to vector<8x1xf32>
    %15 = arith.divf %12, %14 : vector<8x1xf32>
    %cst_8 = arith.constant 0.000000e+00 : f32
    %16 = vector.broadcast %cst_8 : f32 to vector<8x1xf32>
    %17 = arith.maximumf %15, %16 : vector<8x1xf32>
    %18 = math.sqrt %17 : vector<8x1xf32>
    %cst_9 = arith.constant dense<0.000000e+00> : vector<8xf32>
    %19 = vector.multi_reduction <add>, %1, %cst_9 [1] : vector<8x256xf32> to vector<8xf32>
    %20 = vector.shape_cast %19 : vector<8xf32> to vector<8x1xf32>
    %21 = arith.mulf %1, %1 : vector<8x256xf32>
    %cst_10 = arith.constant dense<0.000000e+00> : vector<8xf32>
    %22 = vector.multi_reduction <add>, %21, %cst_10 [1] : vector<8x256xf32> to vector<8xf32>
    %23 = vector.shape_cast %22 : vector<8xf32> to vector<8x1xf32>
    %cst_11 = arith.constant 2.560000e+02 : f32
    %24 = vector.broadcast %cst_11 : f32 to vector<8x1xf32>
    %25 = arith.divf %20, %24 : vector<8x1xf32>
    %cst_12 = arith.constant 2.560000e+02 : f32
    %26 = vector.broadcast %cst_12 : f32 to vector<8x1xf32>
    %27 = arith.mulf %26, %25 : vector<8x1xf32>
    %28 = arith.mulf %27, %25 : vector<8x1xf32>
    %29 = arith.subf %23, %28 : vector<8x1xf32>
    %cst_13 = arith.constant 2.560000e+02 : f32
    %cst_14 = arith.constant 1.000000e+00 : f32
    %30 = arith.subf %cst_13, %cst_14 : f32
    %31 = vector.broadcast %30 : f32 to vector<8x1xf32>
    %32 = arith.divf %29, %31 : vector<8x1xf32>
    %cst_15 = arith.constant 0.000000e+00 : f32
    %33 = vector.broadcast %cst_15 : f32 to vector<8x1xf32>
    %34 = arith.maximumf %32, %33 : vector<8x1xf32>
    %35 = math.sqrt %34 : vector<8x1xf32>
    %cst_16 = arith.constant 9.99999974E-6 : f32
    %36 = vector.broadcast %cst_16 : f32 to vector<8x1xf32>
    %37 = arith.addf %18, %36 : vector<8x1xf32>
    %38 = arith.divf %35, %37 : vector<8x1xf32>
    %39 = vector.broadcast %8 : vector<8x1xf32> to vector<8x256xf32>
    %40 = arith.subf %0, %39 : vector<8x256xf32>
    %41 = vector.broadcast %38 : vector<8x1xf32> to vector<8x256xf32>
    %42 = arith.mulf %40, %41 : vector<8x256xf32>
    %43 = vector.broadcast %25 : vector<8x1xf32> to vector<8x256xf32>
    %44 = arith.addf %42, %43 : vector<8x256xf32>
    %c0_17 = arith.constant 0 : index
    %c0_18 = arith.constant 0 : index
    %45 = vector.load %arg3[%c0_17, %c0_18] : memref<8x256xf32, #tpu.memory_space<vmem>>, vector<8x256xf32>
    tpu.vector_store %arg3[%c0_17, %c0_18], %44 {strides = array<i32>} : memref<8x256xf32, #tpu.memory_space<vmem>>, vector<8x256xf32>,
    return
  }
  func.func @transform_0(%arg0: i32) -> (i32, i32) {
    %c0_i32 = arith.constant 0 : i32
    %c0_i32_0 = arith.constant 0 : i32
    return %arg0, %c0_i32 : i32, i32
  }
  func.func @transform_1(%arg0: i32) -> (i32, i32) {
    %c0_i32 = arith.constant 0 : i32
    %c0_i32_0 = arith.constant 0 : i32
    return %arg0, %c0_i32 : i32, i32
  }
  func.func @transform_2(%arg0: i32) -> (i32, i32) {
    %c0_i32 = arith.constant 0 : i32
    %c0_i32_0 = arith.constant 0 : i32
    return %arg0, %c0_i32 : i32, i32
  }
}

</mosaic_0001>

<bundles_post_ra>
// kernel: tpu_custom_call.1
= control target key start
LH: loop header
LB: loop body
LE: loop exit
PB: predicated region body
PF: predicated region fallthrough
CT: control target
= control target key end

     0   :  { %7 = vsyncpa [#allocation3], 0  ;;  %s213_s0 = inlined_call_operand.hbm [shape: f32[8,256], index: 0, kind: input, shape index: {}]   ;;  %s214_s1 = inlined_call_operand.hbm [shape: f32[8,256], index: 1, kind: input, shape index: {}]   ;;  %s215_s2 = inlined_call_operand.hbm [shape: f32[8,256], index: 2, kind: output, shape index: {}]  }
   0x1   :  { %8 = vsyncpa [#allocation6], 0 }
   0x2   :  { %9 = vsyncpa [#allocation4], 0  ;;  %s186_s9 = smov [#allocation2]   ;;  %s187_s11 = smov [#allocation5]  }
   0x3   :  { %s16_s10 = sshll.u32 %s186_s9, 4  ;;  %s26_s12 = sshll.u32 %s187_s11, 4  ;;  %s17_s10 = int_to_ptr.vmem [resolvable:$true] %s16_s10  ;;  %s27_s12 = int_to_ptr.vmem [resolvable:$true] %s26_s12 }
   0x4   :  { %s128_s13 = scalar_lea.vmem %s17_s10, 256  ;;  %p133_p1 = scmp.lt.s32.totalorder %s17_s10, %s17_s10 }
   0x5   :  { %p129_p0 = scmp.ne.s32.totalorder %s17_s10, %s128_s13  ;;  %p134_p2 = scmp.lt.s32.totalorder %s128_s13, %s128_s13 }
   0x7   :  { %p135_p3 = por %p134_p2, %p133_p1 }
   0x9   :  { %p136_p4 = pnand %p135_p3, %p129_p0 }
   0xb   :  { %139 = shalt.err (!%p136_p4)
}
   0xc   :  { %19 = dma.hbm_to_vmem [thread:$0]  %s213_s0, 256, %s17_s10, [#allocation3]  }
   0xd   :  { %s148_s16 = scalar_lea.vmem %s27_s12, 256  ;;  %p153_p6 = scmp.lt.s32.totalorder %s27_s12, %s27_s12 }
   0xe   :  { %p149_p5 = scmp.ne.s32.totalorder %s27_s12, %s148_s16  ;;  %p154_p7 = scmp.lt.s32.totalorder %s148_s16, %s148_s16 }
  0x10   :  { %p155_p8 = por %p154_p7, %p153_p6 }
  0x12   :  { %p156_p9 = pnand %p155_p8, %p149_p5 }
  0x14   :  { %159 = shalt.err (!%p156_p9)
}
  0x15   :  { %29 = dma.hbm_to_vmem [thread:$0]  %s214_s1, 256, %s27_s12, [#allocation6]  }
  0x16   :  { %180 = dma.done.wait [#allocation3], 256  }
  0x17   :  { %181 = vsyncadd [#allocation3], 4294967040 }
  0x18   :  { %182 = dma.done.wait [#allocation6], 256  }
  0x19   :  { %183 = vsyncadd [#allocation6], 4294967040  ;;  %v38_v0 = vld [vmem:[#allocation5] sm:$0xff]  ;;  %v39_v1 = vld [vmem:[#allocation5 + $0x8] sm:$0xff]  ;;  %s188_s0 = smov [#allocation7]  }
  0x1a   :  { %v36_v2 = vld [vmem:[#allocation2] sm:$0xff]  ;;  %v63_v3 = vadd.f32 %v39_v1, %v38_v0  ;;  %v66_v4 = vmul.f32 %v38_v0, %v38_v0  ;;  %v67_v5 = vmul.f32 %v39_v1, %v39_v1  ;;  %v37_v6 = vld [vmem:[#allocation2 + $0x8] sm:$0xff]  ;;  %s101_s1 = sshll.u32 %s188_s0, 4  ;;  %s102_s1 = int_to_ptr.vmem [resolvable:$true] %s101_s1 }
  0x1b   :  { %v43_v7 = vmul.f32 %v36_v2, %v36_v2  ;;  %v40_v8 = vadd.f32 %v37_v6, %v36_v2  ;;  %v44_v9 = vmul.f32 %v37_v6, %v37_v6  ;;  %s160_s19 = scalar_lea.vmem %s102_s1, 256  ;;  %p165_p11 = scmp.lt.s32.totalorder %s102_s1, %s102_s1 }
  0x1c   :  { %64 = vadd.xlane.f32.xlu1 %v63_v3  ;;  %v68_v10 = vadd.f32 %v67_v5, %v66_v4  ;;  %p161_p10 = scmp.ne.s32.totalorder %s102_s1, %s160_s19  ;;  %p166_p12 = scmp.lt.s32.totalorder %s160_s19, %s160_s19 }
  0x1d   :  { %41 = vadd.xlane.f32.xlu0 %v40_v8  ;;  %v45_v11 = vadd.f32 %v44_v9, %v43_v7 }
  0x1e   :  { %p167_p13 = por %p166_p12, %p165_p11 }
  0x20   :  { %69 = vadd.xlane.f32.xlu1 %v68_v10  ;;  %p168_p0 = pnand %p167_p13, %p161_p10 }
  0x21   :  { %46 = vadd.xlane.f32.xlu0 %v45_v11 }
  0xa5   :  { %v65_v12 = vpop.xlane.xlu1 %64 }
  0xa6   :  { %v71_v13 = vmul.f32 0.00390625, %v65_v12  ;;  %v42_v14 = vpop.xlane.xlu0 %41 }
  0xa7   :  { %v49_v15 = vmul.f32 0.00390625, %v42_v14 }
  0xa8   :  { %v72_v16 = vmul.f32 256.0, %v71_v13 }
  0xa9   :  { %v50_v17 = vmul.f32 256.0, %v49_v15  ;;  %v70_v22 = vpop.xlane.xlu1 %69  ;;  %v87_v40 = vsub.f32 %v36_v2, %v49_v15  ;;  %v88_v41 = vsub.f32 %v37_v6, %v49_v15 }
  0xaa   :  { %v47_v18 = vpop.xlane.xlu0 %46  ;;  %v73_v20 = vmul.f32 %v72_v16, %v71_v13 }
  0xab   :  { %v51_v19 = vmul.f32 %v50_v17, %v49_v15 }
  0xac   :  { %v74_v24 = vsub.f32 %v70_v22, %v73_v20 }
  0xad   :  { %v52_v21 = vsub.f32 %v47_v18, %v51_v19 }
  0xae   :  { %v75_v26 = vmul.f32 0.003921569, %v74_v24 }
  0xaf   :  { %v54_v23 = vmul.f32 0.003921569, %v52_v21 }
  0xb0   :  { %v76_v27 = vmax.f32 %v75_v26, 0.0 }
  0xb1   :  { %v55_v25 = vmax.f32 %v54_v23, 0.0 }
  0xb2   :  { %vm79_vm2 = vcmp.eq.f32.partialorder %v76_v27, inf  ;;  %v82_v36 = vand.u32 2147483648, %v76_v27  ;;  %vm81_vm3 = vcmp.eq.f32.partialorder %v76_v27, 0.0 }
  0xb3   :  { %114 = vrsqrt.f32 %v55_v25  ;;  %vm58_vm0 = vcmp.eq.f32.partialorder %v55_v25, inf  ;;  %v61_v30 = vand.u32 2147483648, %v55_v25  ;;  %vm60_vm1 = vcmp.eq.f32.partialorder %v55_v25, 0.0 }
  0xb4   :  { %116 = vrsqrt.f32 %v76_v27 }
  0xc0   :  { %v115_v28 = vpop.eup %114 }
  0xc1   :  { %v57_v29 = vmul.f32 %v115_v28, %v55_v25  ;;  %v117_v34 = vpop.eup %116 }
  0xc2   :  { %v78_v35 = vmul.f32 %v117_v34, %v76_v27 }
  0xc3   :  { %v59_v31 = vsel %vm58_vm0, %v55_v25, %v57_v29 }
  0xc4   :  { %v62_v32 = vsel %vm60_vm1, %v61_v30, %v59_v31  ;;  %v80_v37 = vsel %vm79_vm2, %v76_v27, %v78_v35 }
  0xc5   :  { %v84_v33 = vadd.f32 1e-05, %v62_v32  ;;  %v83_v39 = vsel %vm81_vm3, %v82_v36, %v80_v37 }
  0xc7   :  { %118 = vrcp.f32 %v84_v33 }
  0xd4   :  { %v119_v38 = vpop.eup %118 }
  0xd5   :  { %v86_v42 = vmul.f32 %v119_v38, %v83_v39 }
  0xd7   :  { %v89_v43 = vmul.f32 %v87_v40, %v86_v42  ;;  %v90_v44 = vmul.f32 %v88_v41, %v86_v42 }
  0xd9   :  { %v91_v45 = vadd.f32 %v89_v43, %v71_v13  ;;  %v92_v46 = vadd.f32 %v90_v44, %v71_v13 }
  0xdb   :  { %93 = vst [vmem:[#allocation7] sm:$0xff] %v91_v45  ;;  %94 = vst [vmem:[#allocation7 + $0x8] sm:$0xff] %v92_v46 }
  0xdc   :  { %171 = shalt.err (!%p168_p0)
}
  0xdd   :  { %104 = dma.vmem_to_hbm [thread:$0]  %s102_s1, 256, %s215_s2, [#allocation4]  }
  0xde   :  { %184 = dma.done.wait [#allocation4], 256  }
  0xdf   :  { %185 = vsyncadd [#allocation4], 4294967040 }
  0xe0   :  { %108 = vsyncpa [#allocation3], 1 }
  0xe1   :  { %109 = vsyncpa [#allocation6], 1 }
  0xe2   :  { %110 = vsyncpa [#allocation4], 1 }

</bundles_post_ra>
